<compile_context>
chip_gen: v7x
topology: tpu7x:2x2x1
jax: 0.10.0
libtpu: 0.0.40
codegen_flags: <defaults>
</compile_context>

<pallas_src>
import jax
import jax.numpy as jnp
from jax.experimental import pallas as pl
from jax.experimental.pallas import tpu as pltpu


def _round_up(x, m):
    return ((x + m - 1) // m) * m


def _pick_low_tile(total_ml):
    """Low-res M tile: a multiple of 8 that divides total_ml, preferring >=2
    grid steps (v7x has 2 TensorCores) while keeping each high-res GEMM at
    M = 4*tile rows (~512 at tile=128, per the review's sizing)."""
    for t in (128, 64, 32, 16, 8):
        if total_ml % t == 0 and total_ml // t >= 2:
            return t
    return total_ml  # single-step fallback (block == full extent is legal)


# -----------------------------------------------------------------------------
# Fused kernel.  All operands arrive pre-packed as GEMM inputs.
#   xh : (4, tml, Kh_p)  bf16  pixel-shuffled im2col patches of hf
#                              (group g = (h%2)*2 + (w%2); within a group rows
#                               are ordered exactly like the low-res rows)
#   xl : (tml, Kl_p)     bf16  im2col patches of [lf ++ avgpool(hf)]
#   wh : (Kh_p, 128)     bf16  packed H2H weight
#   wl : (Kl_p, 128)     bf16  combined low weight: lanes [0,hf_out) = L2H,
#                              lanes [hf_out, hf_out+lf_out) = L2L + H2L
#   bh : (1, 128)        f32   H2H bias
#   bl : (1, 128)        f32   [L2H_b | L2L_b + H2L_b] bias
# outputs (bf16, lane-dense 128 wide):
#   oh : (4, tml, 128)   hf_out in pixel-shuffle order
#                        (lanes >= hf_out contain lf_out garbage, sliced away)
#   ol : (tml, 128)      lanes [hf_out, hf_out+lf_out) = lf_out
# -----------------------------------------------------------------------------
def _octconv_kernel(xh_ref, xl_ref, wh_ref, wl_ref, bh_ref, bl_ref,
                    oh_ref, ol_ref):
    # Single K-packed MXU contraction covering L2H, L2L and H2L at low res.
    low = jnp.dot(xl_ref[...], wl_ref[...],
                  preferred_element_type=jnp.float32) + bl_ref[...]
    ol_ref[...] = low.astype(ol_ref.dtype)

    # High-res H2H conv: all four pixel-shuffle row groups in one M=4*tml GEMM
    # (collapse of tile-aligned leading dims is layout-free).
    xh = xh_ref[...]                                     # (4, tml, Kh_p)
    g, m, k = xh.shape
    h2h = jnp.dot(xh.reshape(g * m, k), wh_ref[...],
                  preferred_element_type=jnp.float32)
    h2h = h2h.reshape(g, m, -1) + bh_ref[...]

    # Nearest-2x upsample of the L2H lanes is now a pure VPU broadcast-add:
    # every pixel-shuffle row group receives `low` once.  Lanes >= hf_out pick
    # up lf_out garbage; they are sliced away in the wrapper, so stores stay
    # lane-dense (unmasked).
    oh_ref[...] = (h2h + low[None]).astype(oh_ref.dtype)


# ----------------------------- wrapper glue (XLA) -----------------------------

def _im2col(x, KH, KW, padding):
    """x: (N, H, W, C) -> (N, Ho, Wo, KH*KW*C), stride 1, zero padding."""
    N, H, W, C = x.shape
    xp = jnp.pad(x, ((0, 0), (padding, padding), (padding, padding), (0, 0)))
    Ho = H + 2 * padding - KH + 1
    Wo = W + 2 * padding - KW + 1
    cols = [xp[:, kh:kh + Ho, kw:kw + Wo, :]
            for kh in range(KH) for kw in range(KW)]
    return jnp.concatenate(cols, axis=-1), Ho, Wo


def _oihw_to_kpack(w):
    """(O, I, KH, KW) -> (KH*KW*I, O) matching _im2col's (kh, kw, c) order."""
    O, I, KH, KW = w.shape
    return jnp.transpose(w, (2, 3, 1, 0)).reshape(KH * KW * I, O)


def oct_conv_normal_nhwc(hf, lf, params, padding):
    """OctConv forward, type='normal', stride=1.  NHWC in / NHWC out (f32)."""
    N, H, W, c_hf_in = hf.shape
    _, Hl, Wl, c_lf_in = lf.shape
    c_hf_out, _, KH, KW = params["H2H_w"].shape
    c_lf_out = params["L2L_w"].shape[0]
    assert H % 2 == 0 and W % 2 == 0 and (Hl, Wl) == (H // 2, W // 2)
    assert c_hf_out <= 128 and (c_hf_out + c_lf_out) <= 128

    # 2x2 avg-pool of hf (f32), channel-concat with lf -> shared low-res input.
    hf_pool = hf.reshape(N, Hl, 2, Wl, 2, c_hf_in).mean(axis=(2, 4))
    xlow = jnp.concatenate([lf, hf_pool], axis=-1)           # (N, Hl, Wl, lf+hf)

    xh_p, Ho, Wo = _im2col(hf, KH, KW, padding)               # (N, H, W, Kh)
    xl_p, Hlo, Wlo = _im2col(xlow, KH, KW, padding)           # (N, Hl, Wl, Kl)
    assert (Ho, Wo) == (H, W) and (Hlo, Wlo) == (Hl, Wl), \
        "fused kernel assumes 'same' padding with stride 1"

    Kh = KH * KW * c_hf_in
    Kl = KH * KW * (c_lf_in + c_hf_in)
    Kh_p, Kl_p = _round_up(Kh, 128), _round_up(Kl, 128)
    Co_p = 128
    Ml = Hl * Wl
    total_ml = N * Ml                                          # batch folded into M

    # Pixel-shuffle the high-res patches: group by 2x2 offset g = dy*2 + dx,
    # within each group order rows exactly like the low-res rows (n, hl, wl).
    xh = xh_p.reshape(N, Hl, 2, Wl, 2, Kh)
    xh = jnp.transpose(xh, (2, 4, 0, 1, 3, 5)).reshape(4, total_ml, Kh)
    xh = jnp.pad(xh, ((0, 0), (0, 0), (0, Kh_p - Kh))).astype(jnp.bfloat16)

    xl = xl_p.reshape(total_ml, Kl)
    xl = jnp.pad(xl, ((0, 0), (0, Kl_p - Kl))).astype(jnp.bfloat16)

    # H2H packed weight.
    wh = _oihw_to_kpack(params["H2H_w"])
    wh = jnp.pad(wh, ((0, Kh_p - Kh), (0, Co_p - c_hf_out))).astype(jnp.bfloat16)

    # Combined low-res weight over Cin = [lf | pooled hf]:
    #   out lanes [0, c_hf_out)                 <- L2H(lf)
    #   out lanes [c_hf_out, c_hf_out+c_lf_out) <- L2L(lf) + H2L(pooled hf)
    l2h = jnp.transpose(params["L2H_w"], (2, 3, 1, 0))   # (KH,KW,lf_in,hf_out)
    l2l = jnp.transpose(params["L2L_w"], (2, 3, 1, 0))   # (KH,KW,lf_in,lf_out)
    h2l = jnp.transpose(params["H2L_w"], (2, 3, 1, 0))   # (KH,KW,hf_in,lf_out)
    w_lf_rows = jnp.concatenate([l2h, l2l], axis=-1)
    w_hf_rows = jnp.concatenate(
        [jnp.zeros((KH, KW, c_hf_in, c_hf_out), l2h.dtype), h2l], axis=-1)
    wl = jnp.concatenate([w_lf_rows, w_hf_rows], axis=2)
    wl = wl.reshape(Kl, c_hf_out + c_lf_out)
    wl = jnp.pad(wl, ((0, Kl_p - Kl),
                      (0, Co_p - (c_hf_out + c_lf_out)))).astype(jnp.bfloat16)

    bh = jnp.pad(params["H2H_b"],
                 (0, Co_p - c_hf_out)).astype(jnp.float32).reshape(1, Co_p)
    bl = jnp.pad(
        jnp.concatenate([params["L2H_b"],
                         params["L2L_b"] + params["H2L_b"]]),
        (0, Co_p - (c_hf_out + c_lf_out))).astype(jnp.float32).reshape(1, Co_p)

    tml = _pick_low_tile(total_ml)
    grid = (total_ml // tml,)

    oh, ol = pl.pallas_call(
        _octconv_kernel,
        out_shape=(jax.ShapeDtypeStruct((4, total_ml, Co_p), jnp.bfloat16),
                   jax.ShapeDtypeStruct((total_ml, Co_p), jnp.bfloat16)),
        grid=grid,
        in_specs=[
            pl.BlockSpec((4, tml, Kh_p), lambda i: (0, i, 0)),
            pl.BlockSpec((tml, Kl_p), lambda i: (i, 0)),
            pl.BlockSpec((Kh_p, Co_p), lambda i: (0, 0)),   # weights resident
            pl.BlockSpec((Kl_p, Co_p), lambda i: (0, 0)),
            pl.BlockSpec((1, Co_p), lambda i: (0, 0)),
            pl.BlockSpec((1, Co_p), lambda i: (0, 0)),
        ],
        out_specs=(pl.BlockSpec((4, tml, Co_p), lambda i: (0, i, 0)),
                   pl.BlockSpec((tml, Co_p), lambda i: (i, 0))),
        compiler_params=pltpu.CompilerParams(
            dimension_semantics=("parallel",)),
    )(xh, xl, wh, wl, bh, bl)

    # Un-permute the pixel-shuffled high-res output and slice logical lanes.
    oh = oh.reshape(2, 2, N, Hl, Wl, Co_p)
    oh = jnp.transpose(oh, (2, 3, 0, 4, 1, 5)).reshape(N, H, W, Co_p)
    hf_out = oh[..., :c_hf_out].astype(jnp.float32)
    lf_out = ol.reshape(N, Hl, Wl, Co_p)[..., c_hf_out:c_hf_out + c_lf_out]
    return hf_out, lf_out.astype(jnp.float32)


def oct_conv_normal(hf_nchw, lf_nchw, params, padding):
    """Public API mirroring the PyTorch module: NCHW in, NCHW out."""
    hf = jnp.transpose(hf_nchw, (0, 2, 3, 1))
    lf = jnp.transpose(lf_nchw, (0, 2, 3, 1))
    hf_out, lf_out = oct_conv_normal_nhwc(hf, lf, params, padding)
    return (jnp.transpose(hf_out, (0, 3, 1, 2)),
            jnp.transpose(lf_out, (0, 3, 1, 2)))


# ---------------- reference (pure JAX f32, for validation only) ----------------

def _conv_ref_nchw(x, w_oihw, b, padding):
    y = jax.lax.conv_general_dilated(
        x, w_oihw, window_strides=(1, 1),
        padding=[(padding, padding), (padding, padding)],
        dimension_numbers=("NCHW", "OIHW", "NCHW"))
    return y + b.reshape(1, -1, 1, 1)


def oct_conv_normal_ref(hf, lf, params, padding):
    def ap(x):  # 2x2 avg pool, NCHW
        N, C, H, W = x.shape
        return x.reshape(N, C, H // 2, 2, W // 2, 2).mean(axis=(3, 5))

    def up(x):  # nearest 2x, NCHW
        return jnp.repeat(jnp.repeat(x, 2, axis=2), 2, axis=3)

    h2h = _conv_ref_nchw(hf, params["H2H_w"], params["H2H_b"], padding)
    l2h = _conv_ref_nchw(lf, params["L2H_w"], params["L2H_b"], padding)
    l2l = _conv_ref_nchw(lf, params["L2L_w"], params["L2L_b"], padding)
    h2l = _conv_ref_nchw(ap(hf), params["H2L_w"], params["H2L_b"], padding)
    return h2h + up(l2h), l2l + h2l


# ---------------------- parameter init & main ----------------------

def init_params(key, hf_in, lf_in, hf_out, lf_out, k):
    ks = jax.random.split(key, 8)
    def w(kk, o, i):
        return 0.1 * jax.random.normal(kk, (o, i, k, k), jnp.float32)  # OIHW
    def b(kk, o):
        return 0.05 * jax.random.normal(kk, (o,), jnp.float32)
    return {
        "H2H_w": w(ks[0], hf_out, hf_in), "H2H_b": b(ks[1], hf_out),
        "L2H_w": w(ks[2], hf_out, lf_in), "L2H_b": b(ks[3], hf_out),
        "L2L_w": w(ks[4], lf_out, lf_in), "L2L_b": b(ks[5], lf_out),
        "H2L_w": w(ks[6], lf_out, hf_in), "H2L_b": b(ks[7], lf_out),
    }


if __name__ == "__main__":
    # OctConv(in_channels=16, out_channels=16, kernel_size=3, padding=1,
    #         alpha_in=0.25, alpha_out=0.25, type='normal', stride=1)
    in_ch, out_ch, ksz, pad, alpha = 16, 16, 3, 1, 0.25
    hf_in = int(in_ch * (1 - alpha)); lf_in = in_ch - hf_in       # 12, 4
    hf_out = int(out_ch * (1 - alpha)); lf_out = out_ch - hf_out  # 12, 4

    N, H, W = 2, 16, 16
    key = jax.random.PRNGKey(0)
    k_hf, k_lf, k_par = jax.random.split(key, 3)
    hf = jax.random.normal(k_hf, (N, hf_in, H, W), jnp.float32)        # NCHW
    lf = jax.random.normal(k_lf, (N, lf_in, H // 2, W // 2), jnp.float32)

    params = init_params(k_par, hf_in, lf_in, hf_out, lf_out, ksz)

    fwd = jax.jit(lambda a, b: oct_conv_normal(a, b, params, pad))
    hf_o, lf_o = fwd(hf, lf)
    jax.block_until_ready((hf_o, lf_o))

    hf_r, lf_r = oct_conv_normal_ref(hf, lf, params, pad)
    assert hf_o.shape == (N, hf_out, H, W)
    assert lf_o.shape == (N, lf_out, H // 2, W // 2)
    # bf16 MXU inputs / bf16 outputs with f32 accumulation -> loosened tolerance.
    assert jnp.allclose(hf_o, hf_r, atol=5e-2, rtol=5e-2), \
        float(jnp.max(jnp.abs(hf_o - hf_r)))
    assert jnp.allclose(lf_o, lf_r, atol=5e-2, rtol=5e-2), \
        float(jnp.max(jnp.abs(lf_o - lf_r)))

    print("KERNEL_OK")
</pallas_src>

<mosaic_0001>
module attributes {stable_mosaic.version = 11 : i64} {
  func.func @_octconv_kernel(%arg0: i32, %arg1: memref<4x64x128xbf16, #tpu.memory_space<vmem>>, %arg2: memref<64x256xbf16, #tpu.memory_space<vmem>>, %arg3: memref<128x128xbf16, #tpu.memory_space<vmem>>, %arg4: memref<256x128xbf16, #tpu.memory_space<vmem>>, %arg5: memref<1x128xf32, #tpu.memory_space<vmem>>, %arg6: memref<1x128xf32, #tpu.memory_space<vmem>>, %arg7: memref<4x64x128xbf16, #tpu.memory_space<vmem>>, %arg8: memref<64x128xbf16, #tpu.memory_space<vmem>>) attributes {dimension_semantics = [#tpu.dimension_semantics<parallel>], iteration_bounds = array<i64: 2>, scalar_prefetch = 0 : i64, scratch_operands = 0 : i64, tpu.core_type = #tpu.core_type<tc>, window_params = [{transform_indices = @transform_0, window_bounds = array<i64: 4, 64, 128>}, {transform_indices = @transform_1, window_bounds = array<i64: 64, 256>}, {pipeline_mode = #tpu.pipeline_mode<synchronous>, transform_indices = @transform_2, window_bounds = array<i64: 128, 128>}, {pipeline_mode = #tpu.pipeline_mode<synchronous>, transform_indices = @transform_3, window_bounds = array<i64: 256, 128>}, {pipeline_mode = #tpu.pipeline_mode<synchronous>, transform_indices = @transform_4, window_bounds = array<i64: 1, 128>}, {pipeline_mode = #tpu.pipeline_mode<synchronous>, transform_indices = @transform_5, window_bounds = array<i64: 1, 128>}, {transform_indices = @transform_6, window_bounds = array<i64: 4, 64, 128>}, {transform_indices = @transform_7, window_bounds = array<i64: 64, 128>}]} {
    %c0 = arith.constant 0 : index
    %c0_0 = arith.constant 0 : index
    %0 = vector.load %arg2[%c0, %c0_0] : memref<64x256xbf16, #tpu.memory_space<vmem>>, vector<64x256xbf16>
    %c0_1 = arith.constant 0 : index
    %c0_2 = arith.constant 0 : index
    %1 = vector.load %arg4[%c0_1, %c0_2] : memref<256x128xbf16, #tpu.memory_space<vmem>>, vector<256x128xbf16>
    %cst = arith.constant dense<0.000000e+00> : vector<64x128xf32>
    %2 = tpu.matmul %0, %1, %cst {dimension_numbers = #tpu.dot_dimension_numbers<[1], [0], [0], [1], [0, 0, 1, 1], [], []>} : vector<64x256xbf16>, vector<256x128xbf16>, vector<64x128xf32> -> vector<64x128xf32>
    %c0_3 = arith.constant 0 : index
    %c0_4 = arith.constant 0 : index
    %3 = vector.load %arg6[%c0_3, %c0_4] : memref<1x128xf32, #tpu.memory_space<vmem>>, vector<1x128xf32>
    %4 = vector.broadcast %3 : vector<1x128xf32> to vector<64x128xf32>
    %5 = arith.addf %2, %4 : vector<64x128xf32>
    %6 = arith.truncf %5 : vector<64x128xf32> to vector<64x128xbf16>
    %c0_5 = arith.constant 0 : index
    %c0_6 = arith.constant 0 : index
    %7 = vector.load %arg8[%c0_5, %c0_6] : memref<64x128xbf16, #tpu.memory_space<vmem>>, vector<64x128xbf16>
    tpu.vector_store %arg8[%c0_5, %c0_6], %6 {strides = array<i32>} : memref<64x128xbf16, #tpu.memory_space<vmem>>, vector<64x128xbf16>,
    %c0_7 = arith.constant 0 : index
    %c0_8 = arith.constant 0 : index
    %c0_9 = arith.constant 0 : index
    %8 = vector.load %arg1[%c0_7, %c0_8, %c0_9] : memref<4x64x128xbf16, #tpu.memory_space<vmem>>, vector<4x64x128xbf16>
    %9 = vector.shape_cast %8 : vector<4x64x128xbf16> to vector<256x128xbf16>
    %c0_10 = arith.constant 0 : index
    %c0_11 = arith.constant 0 : index
    %10 = vector.load %arg3[%c0_10, %c0_11] : memref<128x128xbf16, #tpu.memory_space<vmem>>, vector<128x128xbf16>
    %cst_12 = arith.constant dense<0.000000e+00> : vector<256x128xf32>
    %11 = tpu.matmul %9, %10, %cst_12 {dimension_numbers = #tpu.dot_dimension_numbers<[1], [0], [0], [1], [0, 0, 1, 1], [], []>} : vector<256x128xbf16>, vector<128x128xbf16>, vector<256x128xf32> -> vector<256x128xf32>
    %12 = vector.shape_cast %11 : vector<256x128xf32> to vector<4x64x128xf32>
    %c0_13 = arith.constant 0 : index
    %c0_14 = arith.constant 0 : index
    %13 = vector.load %arg5[%c0_13, %c0_14] : memref<1x128xf32, #tpu.memory_space<vmem>>, vector<1x128xf32>
    %14 = vector.shape_cast %13 : vector<1x128xf32> to vector<1x1x128xf32>
    %15 = vector.broadcast %14 : vector<1x1x128xf32> to vector<4x64x128xf32>
    %16 = arith.addf %12, %15 : vector<4x64x128xf32>
    %17 = vector.shape_cast %5 : vector<64x128xf32> to vector<1x64x128xf32>
    %18 = vector.broadcast %17 : vector<1x64x128xf32> to vector<4x64x128xf32>
    %19 = arith.addf %16, %18 : vector<4x64x128xf32>
    %20 = arith.truncf %19 : vector<4x64x128xf32> to vector<4x64x128xbf16>
    %c0_15 = arith.constant 0 : index
    %c0_16 = arith.constant 0 : index
    %c0_17 = arith.constant 0 : index
    %21 = vector.load %arg7[%c0_15, %c0_16, %c0_17] : memref<4x64x128xbf16, #tpu.memory_space<vmem>>, vector<4x64x128xbf16>
    tpu.vector_store %arg7[%c0_15, %c0_16, %c0_17], %20 {strides = array<i32>} : memref<4x64x128xbf16, #tpu.memory_space<vmem>>, vector<4x64x128xbf16>,
    return
  }
  func.func @transform_0(%arg0: i32) -> (i32, i32, i32) {
    %c0_i32 = arith.constant 0 : i32
    %c0_i32_0 = arith.constant 0 : i32
    %c0_i32_1 = arith.constant 0 : i32
    return %c0_i32, %arg0, %c0_i32_0 : i32, i32, i32
  }
  func.func @transform_1(%arg0: i32) -> (i32, i32) {
    %c0_i32 = arith.constant 0 : i32
    %c0_i32_0 = arith.constant 0 : i32
    return %arg0, %c0_i32 : i32, i32
  }
  func.func @transform_2(%arg0: i32) -> (i32, i32) {
    %c0_i32 = arith.constant 0 : i32
    %c0_i32_0 = arith.constant 0 : i32
    %c0_i32_1 = arith.constant 0 : i32
    return %c0_i32, %c0_i32_0 : i32, i32
  }
  func.func @transform_3(%arg0: i32) -> (i32, i32) {
    %c0_i32 = arith.constant 0 : i32
    %c0_i32_0 = arith.constant 0 : i32
    %c0_i32_1 = arith.constant 0 : i32
    return %c0_i32, %c0_i32_0 : i32, i32
  }
  func.func @transform_4(%arg0: i32) -> (i32, i32) {
    %c0_i32 = arith.constant 0 : i32
    %c0_i32_0 = arith.constant 0 : i32
    %c0_i32_1 = arith.constant 0 : i32
    return %c0_i32, %c0_i32_0 : i32, i32
  }
  func.func @transform_5(%arg0: i32) -> (i32, i32) {
    %c0_i32 = arith.constant 0 : i32
    %c0_i32_0 = arith.constant 0 : i32
    %c0_i32_1 = arith.constant 0 : i32
    return %c0_i32, %c0_i32_0 : i32, i32
  }
  func.func @transform_6(%arg0: i32) -> (i32, i32, i32) {
    %c0_i32 = arith.constant 0 : i32
    %c0_i32_0 = arith.constant 0 : i32
    %c0_i32_1 = arith.constant 0 : i32
    return %c0_i32, %arg0, %c0_i32_0 : i32, i32, i32
  }
  func.func @transform_7(%arg0: i32) -> (i32, i32) {
    %c0_i32 = arith.constant 0 : i32
    %c0_i32_0 = arith.constant 0 : i32
    return %arg0, %c0_i32 : i32, i32
  }
}

</mosaic_0001>

<bundles_post_ra>
// kernel: _lambda_.1
= control target key start
LH: loop header
LB: loop body
LE: loop exit
PB: predicated region body
PF: predicated region fallthrough
CT: control target
= control target key end

     0   :  { %s2167_s24 = smov 0   ;;  %s2169_s25 = smov 0   ;;  %s2557_s0 = inlined_call_operand.vmem [shape: bf16[4,128,128], index: 0, kind: input, shape index: {}]   ;;  %s2558_s1 = inlined_call_operand.vmem [shape: bf16[128,256], index: 1, kind: input, shape index: {}]   ;;  %s2559_s2 = inlined_call_operand.vmem [shape: bf16[128,128], index: 2, kind: input, shape index: {}]   ;;  %s2560_s3 = inlined_call_operand.vmem [shape: bf16[256,128], index: 3, kind: input, shape index: {}]   ;;  %s2561_s4 = inlined_call_operand.vmem [shape: f32[1,128], index: 4, kind: input, shape index: {}]   ;;  %s2562_s5 = inlined_call_operand.vmem [shape: f32[1,128], index: 5, kind: input, shape index: {}]   ;;  %s2563_s6 = inlined_call_operand.vmem [shape: bf16[4,128,128], index: 6, kind: output, shape index: {0}]   ;;  %s2564_s7 = inlined_call_operand.vmem [shape: bf16[128,128], index: 7, kind: output, shape index: {1}]  }
   0x1   :  { %s2171_s26 = smov 0  }
   0x2 LB: > { %s2183_s27 = sadd.s32 4294967295, %s2125_s26   ;;  %s2186_s28 = sadd.s32 1, %s2125_s26   ;;  %s2125_s26 = sphi %s2171_s26, %s2568_s26   ;;  %s2121_s25 = sphi %s2169_s25, %s2567_s25   ;;  %s2117_s24 = sphi %s2167_s24, %s2566_s24  }
   0x3   : > { %s22_s29 = ssub.s32 %s2125_s26, %s2186_s28  ;;  %s25_s30 = sadd.s32 1, %s2121_s25 }
   0x4   : > { %p23_p0 = scmp.eq.s32.totalorder %s22_s29, 0  ;;  %p32_p1 = scmp.ne.s32.totalorder %s2121_s25, %s2117_s24 }
   0x5   : > { %p33_p2 = scmp.eq.s32.totalorder %s2125_s26, 0  ;;  %p172_p3 = scmp.eq.s32.totalorder %s2183_s27, 1 }
   0x6   : > { %s2196_s8 = scalar_select %p23_p0, %s2121_s25, %s25_s30  }
   0x7   : > { %p34_p4 = por %p33_p2, %p32_p1  ;;  %p2198_p5 = por %p172_p3, %p32_p1 }
   0x8   : > { %p1631_p6 = scmp.ge.s32.totalorder %s2125_s26, 2 }
   0xa   : > { %232 = sbr.rel (%p1631_p6) target bundleno = 29 (0x1d), region = 32 }
  0x11   : > { %235 = sbr.rel (!%p34_p4) target bundleno = 29 (0x1d), region = 36  ;;  %s237_s10 = sand.u32 (%p34_p4), 1, %s2121_s25  }
  0x12   : > { %s1738_s11 = sshll.u32 (%p34_p4), %s2125_s26, 5  ;;  %s1632_s12 = sshll.u32 (%p34_p4), %s237_s10, 7 }
  0x13   : > { %s2208_s15 = scalar_lea.vmem (%p34_p4), %s2557_s0, %s1738_s11  ;;  %s239_s16 = scalar_lea.vmem (%p34_p4), [#allocation2], %s1632_s12 }
  0x14   : > { %v258_v0 = vld [vmem:[%s2208_s15] sm:$0xff] (%p34_p4)   ;;  %v262_v1 = vld [vmem:[%s2208_s15 + $0x8] sm:$0xff] (%p34_p4)   ;;  %v266_v2 = vld [vmem:[%s2208_s15 + $0x10] sm:$0xff] (%p34_p4)  }
  0x15   : > { %259 = vst [vmem:[%s239_s16] sm:$0xff] (%p34_p4), %v258_v0   ;;  %263 = vst [vmem:[%s239_s16 + $0x8] sm:$0xff] (%p34_p4), %v262_v1   ;;  %v270_v3 = vld [vmem:[%s2208_s15 + $0x18] sm:$0xff] (%p34_p4)   ;;  %v274_v4 = vld [vmem:[%s2208_s15 + $0x40] sm:$0xff] (%p34_p4)  }
  0x16   : > { %267 = vst [vmem:[%s239_s16 + $0x10] sm:$0xff] (%p34_p4), %v266_v2   ;;  %v278_v5 = vld [vmem:[%s2208_s15 + $0x48] sm:$0xff] (%p34_p4)   ;;  %271 = vst [vmem:[%s239_s16 + $0x18] sm:$0xff] (%p34_p4), %v270_v3   ;;  %v282_v6 = vld [vmem:[%s2208_s15 + $0x50] sm:$0xff] (%p34_p4)  }
  0x17   : > { %275 = vst [vmem:[%s239_s16 + $0x20] sm:$0xff] (%p34_p4), %v274_v4   ;;  %279 = vst [vmem:[%s239_s16 + $0x28] sm:$0xff] (%p34_p4), %v278_v5   ;;  %v286_v7 = vld [vmem:[%s2208_s15 + $0x58] sm:$0xff] (%p34_p4)   ;;  %v290_v8 = vld [vmem:[%s2208_s15 + $0x80] sm:$0xff] (%p34_p4)  }
  0x18   : > { %283 = vst [vmem:[%s239_s16 + $0x30] sm:$0xff] %v282_v6   ;;  %287 = vst [vmem:[%s239_s16 + $0x38] sm:$0xff] %v286_v7   ;;  %v294_v9 = vld [vmem:[%s2208_s15 + $0x88] sm:$0xff]   ;;  %v298_v10 = vld [vmem:[%s2208_s15 + $0x90] sm:$0xff]  }
  0x19   : > { %291 = vst [vmem:[%s239_s16 + $0x40] sm:$0xff] %v290_v8   ;;  %v302_v11 = vld [vmem:[%s2208_s15 + $0x98] sm:$0xff]   ;;  %295 = vst [vmem:[%s239_s16 + $0x48] sm:$0xff] %v294_v9   ;;  %v306_v12 = vld [vmem:[%s2208_s15 + $0xc0] sm:$0xff]  }
  0x1a   : > { %299 = vst [vmem:[%s239_s16 + $0x50] sm:$0xff] %v298_v10   ;;  %303 = vst [vmem:[%s239_s16 + $0x58] sm:$0xff] %v302_v11   ;;  %v310_v13 = vld [vmem:[%s2208_s15 + $0xc8] sm:$0xff]   ;;  %v314_v14 = vld [vmem:[%s2208_s15 + $0xd0] sm:$0xff]  }
  0x1b   : > { %307 = vst [vmem:[%s239_s16 + $0x60] sm:$0xff] %v306_v12   ;;  %311 = vst [vmem:[%s239_s16 + $0x68] sm:$0xff] %v310_v13   ;;  %v318_v15 = vld [vmem:[%s2208_s15 + $0xd8] sm:$0xff]  }
  0x1c   : > { %315 = vst [vmem:[%s239_s16 + $0x70] sm:$0xff] %v314_v14   ;;  %319 = vst [vmem:[%s239_s16 + $0x78] sm:$0xff] %v318_v15  }
  0x1d PF: > { %p1635_p7 = scmp.ge.s32.totalorder %s2125_s26, 1  ;;  %p417_p8 = scmp.lt.s32.totalorder %s2125_s26, 3 }
  0x1f   : > { %p418_p9 = pnand %p1635_p7, %p417_p8 }
  0x20   : > { %v2051_v16 = vld [vmem:[%s2560_s3 + $0x40] sm:$0xff] (!%p418_p9)   ;;  %v2054_v19 = vld [vmem:[%s2560_s3 + $0x48] sm:$0xff] (!%p418_p9)   ;;  %v2057_v22 = vld [vmem:[%s2560_s3 + $0x50] sm:$0xff] (!%p418_p9)   ;;  %s1638_s18 = sshll.u32 (!%p418_p9), %s2183_s27, 3  ;;  %s424_s19 = sand.u32 (!%p418_p9), 1, %s2117_s24  }
  0x21   : > { %421 = sbr.rel (%p418_p9) target bundleno = 337 (0x151), region = 81  ;;  %v2234_v17 = vld [vmem:[%s2559_s2] sm:$0xff] (!%p418_p9)   ;;  %1899 = vmatprep.subr.bf16.mxu0 (!%p418_p9), %v2051_v16  ;;  %v2247_v20 = vld [vmem:[%s2559_s2 + $0x8] sm:$0xff] (!%p418_p9)   ;;  %v2259_v23 = vld [vmem:[%s2559_s2 + $0x10] sm:$0xff] (!%p418_p9)   ;;  %p467_p10 = scmp.lt.s32.totalorder (!%p418_p9), %s1638_s18, 15 }
  0x22   : > { %v2053_v18 = vld [vmem:[%s2560_s3] sm:$0xff] (!%p418_p9)   ;;  %2011 = vmatprep.subr.bf16.mxu1 (!%p418_p9), %v2234_v17  ;;  %v2056_v21 = vld [vmem:[%s2560_s3 + $0x8] sm:$0xff] (!%p418_p9)   ;;  %v2059_v24 = vld [vmem:[%s2560_s3 + $0x10] sm:$0xff] (!%p418_p9)   ;;  %s2312_s29 = sshll.u32 (!%p418_p9), %s424_s19, 7 }
  0x23   : > { %1900 = vmatpush3.bf16.msra.mxu0 (!%p418_p9), %v2053_v18  ;;  %2019 = vmatpush3.bf16.msra.mxu1 (!%p418_p9), %v2234_v17  ;;  %v2060_v25 = vld [vmem:[%s2560_s3 + $0x58] sm:$0xff] (!%p418_p9)   ;;  %v2063_v28 = vld [vmem:[%s2560_s3 + $0x60] sm:$0xff] (!%p418_p9)   ;;  %v2066_v31 = vld [vmem:[%s2560_s3 + $0x68] sm:$0xff] (!%p418_p9)   ;;  %s2340_s20 = scalar_lea.vmem (!%p418_p9), [#allocation2], %s2312_s29 }
  0x24   : > { %1901 = vmatprep.subr.bf16.mxu0 (!%p418_p9), %v2054_v19  ;;  %2012 = vmatprep.subr.bf16.mxu1 (!%p418_p9), %v2247_v20  ;;  %v2273_v26 = vld [vmem:[%s2559_s2 + $0x18] sm:$0xff] (!%p418_p9)   ;;  %v2286_v29 = vld [vmem:[%s2559_s2 + $0x20] sm:$0xff] (!%p418_p9)   ;;  %v2301_v32 = vld [vmem:[%s2559_s2 + $0x28] sm:$0xff] (!%p418_p9)  }
  0x25   : > { %v2062_v27 = vld [vmem:[%s2560_s3 + $0x18] sm:$0xff] (!%p418_p9)   ;;  %v2065_v30 = vld [vmem:[%s2560_s3 + $0x20] sm:$0xff] (!%p418_p9)   ;;  %v2068_v33 = vld [vmem:[%s2560_s3 + $0x28] sm:$0xff] (!%p418_p9)  }
  0x26   : > { %v2069_v34 = vld [vmem:[%s2560_s3 + $0x70] sm:$0xff] (!%p418_p9)   ;;  %v2072_v37 = vld [vmem:[%s2560_s3 + $0x78] sm:$0xff] (!%p418_p9)   ;;  %v2078_v40 = vld [vmem:[%s2340_s20 + $0x20] sm:$0xff] (!%p418_p9)  }
  0x27   : > { %1902 = vmatpush3.bf16.msra.mxu0 (!%p418_p9), %v2056_v21  ;;  %2020 = vmatpush3.bf16.msra.mxu1 (!%p418_p9), %v2247_v20  ;;  %v2318_v35 = vld [vmem:[%s2559_s2 + $0x30] sm:$0xff] (!%p418_p9)   ;;  %v2335_v38 = vld [vmem:[%s2559_s2 + $0x38] sm:$0xff] (!%p418_p9)   ;;  %v2079_v43 = vld [vmem:[%s2340_s20 + $0x28] sm:$0xff] (!%p418_p9)  }
  0x28   : > { %1903 = vmatprep.subr.bf16.mxu0 %v2057_v22  ;;  %2013 = vmatprep.subr.bf16.mxu1 %v2259_v23  ;;  %s2570_s18 = smov (!%p467_p10, %s1638_s18), 15  ;;  %v2071_v36 = vld [vmem:[%s2560_s3 + $0x30] sm:$0xff]   ;;  %v2074_v41 = vld [vmem:[%s2560_s3 + $0x38] sm:$0xff]   ;;  %v2087_v49 = vld [vmem:[%s2340_s20 + $0x40] sm:$0xff]  }
  0x29   : > { %s1739_s22 = sshll.u32 %s2570_s18, 3  ;;  %1987 = vmatprep.mubr.bf16.mxu1 %v2078_v40  ;;  %v2082_v45 = vld [vmem:[%s2340_s20 + $0x30] sm:$0xff]   ;;  %v2084_v47 = vld [vmem:[%s2340_s20 + $0x38] sm:$0xff]   ;;  %v2089_v51 = vld [vmem:[%s2340_s20 + $0x48] sm:$0xff]   ;;  %s1642_s10 = sshll.u32 %s2570_s18, 2 }
  0x2a   : > { %s2326_s14 = scalar_lea.vmem %s2558_s1, %s1739_s22  ;;  %v2092_v53 = vld [vmem:[%s2340_s20 + $0x50] sm:$0xff]   ;;  %v2094_v55 = vld [vmem:[%s2340_s20 + $0x58] sm:$0xff]   ;;  %v2095_v56 = vld [vmem:[%s2340_s20] sm:$0xff]   ;;  %s2410_s13 = scalar_lea.vmem %s2564_s7, %s1642_s10 }
  0x2b   : > { %1904 = vmatpush3.bf16.msra.mxu0 %v2059_v24  ;;  %2021 = vmatpush3.bf16.msra.mxu1 %v2259_v23  ;;  %v2077_v39 = vld [vmem:[%s2326_s14 + $0x4] ss:$8 sps:$4 sm:$0xff]   ;;  %v2075_v42 = vld [vmem:[%s2326_s14] ss:$8 sps:$4 sm:$0xff]   ;;  %v2080_v44 = vld [vmem:[%s2326_s14 + $0x14] ss:$8 sps:$4 sm:$0xff]  }
  0x2c   : > { %1905 = vmatprep.subr.bf16.mxu0 %v2060_v25  ;;  %2014 = vmatprep.subr.bf16.mxu1 %v2273_v26  ;;  %v2083_v46 = vld [vmem:[%s2326_s14 + $0x10] ss:$8 sps:$4 sm:$0xff]   ;;  %v2085_v48 = vld [vmem:[%s2326_s14 + $0x24] ss:$8 sps:$4 sm:$0xff]   ;;  %v2088_v50 = vld [vmem:[%s2326_s14 + $0x20] ss:$8 sps:$4 sm:$0xff]  }
  0x2d   : > { %696 = vmatprep.mubr.bf16.mxu0 %v2077_v39  ;;  %v2090_v52 = vld [vmem:[%s2326_s14 + $0x34] ss:$8 sps:$4 sm:$0xff]   ;;  %v2093_v54 = vld [vmem:[%s2326_s14 + $0x30] ss:$8 sps:$4 sm:$0xff]   ;;  %v2096_v57 = vld [vmem:[%s2340_s20 + $0x60] sm:$0xff]   ;;  %s2420_s18 = scalar_lea.vmem [#allocation3], %s2312_s29 }
  0x2e   : > { %v2097_v58 = vld [vmem:[%s2340_s20 + $0x8] sm:$0xff]   ;;  %v2099_v60 = vld [vmem:[%s2340_s20 + $0x10] sm:$0xff]   ;;  %v2101_v62 = vld [vmem:[%s2340_s20 + $0x18] sm:$0xff]   ;;  %s1780_s29 = sshll.u32 (%p2198_p5), %s2183_s27, 5 }
  0x2f   : > { %1906 = vmatpush3.bf16.msra.mxu0 %v2062_v27  ;;  %2022 = vmatpush3.bf16.msra.mxu1 %v2273_v26  ;;  %v2098_v59 = vld [vmem:[%s2340_s20 + $0x68] sm:$0xff]   ;;  %v2100_v61 = vld [vmem:[%s2340_s20 + $0x70] sm:$0xff]   ;;  %v2102_v63 = vld [vmem:[%s2340_s20 + $0x78] sm:$0xff]   ;;  %s1367_s16 = scalar_lea.vmem (%p2198_p5), %s2563_s6, %s1780_s29 }
  0x30   : > { %1907 = vmatprep.subr.bf16.mxu0 %v2063_v28  ;;  %2015 = vmatprep.subr.bf16.mxu1 %v2286_v29  ;;  %v2390_v2 = vld [vmem:[%s2561_s4] ss:$0 sm:$0xff] }
  0x31   : > { %v2395_v3 = vld [vmem:[%s2562_s5] ss:$0 sm:$0xff] }
  0x33   : > { %1908 = vmatpush3.bf16.msra.mxu0 %v2065_v30  ;;  %2023 = vmatpush3.bf16.msra.mxu1 %v2286_v29 }
  0x34   : > { %1909 = vmatprep.subr.bf16.mxu0 %v2066_v31  ;;  %2016 = vmatprep.subr.bf16.mxu1 %v2301_v32 }
  0x37   : > { %1910 = vmatpush3.bf16.msra.mxu0 %v2068_v33  ;;  %2024 = vmatpush3.bf16.msra.mxu1 %v2301_v32 }
  0x38   : > { %1911 = vmatprep.subr.bf16.mxu0 %v2069_v34  ;;  %2017 = vmatprep.subr.bf16.mxu1 %v2318_v35 }
  0x3b   : > { %1912 = vmatpush3.bf16.msra.mxu0 %v2071_v36  ;;  %2025 = vmatpush3.bf16.msra.mxu1 %v2318_v35 }
  0x3c   : > { %1913 = vmatprep.subr.bf16.mxu0 %v2072_v37  ;;  %2018 = vmatprep.subr.bf16.mxu1 %v2335_v38 }
  0x3f   : > { %1914 = vmatpush3.bf16.msra.mxu0 %v2074_v41  ;;  %2026 = vmatpush3.bf16.msra.mxu1 %v2335_v38 }
  0x40   : > { %1963 = vmatprep.subr.bf16.mxu0 %v2234_v17 }
  0x42   : > { %697 = vmatmul.mubr.bf16.vlgmr.msra.gmra.mrb[0].mxu0 %v2075_v42  ;;  %1988 = vmatmul.mubr.bf16.vlgmr.msra.gmra.mrb[0].mxu1 %v2079_v43 }
  0x43   : > { %1964 = vmatpush3.bf16.msra.mxu0 %v2234_v17  ;;  %704 = vmatprep.mubr.bf16.mxu0 %v2080_v44 }
  0x44   : > { %1965 = vmatprep.subr.bf16.mxu0 %v2247_v20  ;;  %1991 = vmatprep.mubr.bf16.mxu1 %v2082_v45 }
  0x47   : > { %1966 = vmatpush3.bf16.msra.mxu0 %v2247_v20 }
  0x48   : > { %1967 = vmatprep.subr.bf16.mxu0 %v2259_v23 }
  0x4a   : > { %705 = vmatmul.mubr.bf16.gmra.mrb[4].mxu0 %v2083_v46  ;;  %1992 = vmatmul.mubr.bf16.gmra.mrb[4].mxu1 %v2084_v47 }
  0x4b   : > { %1968 = vmatpush3.bf16.msra.mxu0 %v2259_v23  ;;  %712 = vmatprep.mubr.bf16.mxu0 %v2085_v48 }
  0x4c   : > { %1969 = vmatprep.subr.bf16.mxu0 %v2273_v26  ;;  %1995 = vmatprep.mubr.bf16.mxu1 %v2087_v49 }
  0x4f   : > { %1970 = vmatpush3.bf16.msra.mxu0 %v2273_v26 }
  0x50   : > { %1971 = vmatprep.subr.bf16.mxu0 %v2286_v29 }
  0x52   : > { %713 = vmatmul.mubr.bf16.gmra.mrb[8].mxu0 %v2088_v50  ;;  %1996 = vmatmul.mubr.bf16.gmra.mrb[8].mxu1 %v2089_v51 }
  0x53   : > { %1972 = vmatpush3.bf16.msra.mxu0 %v2286_v29  ;;  %720 = vmatprep.mubr.bf16.mxu0 %v2090_v52 }
  0x54   : > { %1973 = vmatprep.subr.bf16.mxu0 %v2301_v32  ;;  %1999 = vmatprep.mubr.bf16.mxu1 %v2092_v53 }
  0x57   : > { %1974 = vmatpush3.bf16.msra.mxu0 %v2301_v32 }
  0x58   : > { %1975 = vmatprep.subr.bf16.mxu0 %v2318_v35 }
  0x5a   : > { %721 = vmatmul.mubr.bf16.gmra.mrb[12].mxu0 %v2093_v54  ;;  %2000 = vmatmul.mubr.bf16.gmra.mrb[12].mxu1 %v2094_v55 }
  0x5b   : > { %1976 = vmatpush3.bf16.msra.mxu0 %v2318_v35  ;;  %1979 = vmatprep.mubr.bf16.mxu0 %v2095_v56 }
  0x5c   : > { %1977 = vmatprep.subr.bf16.mxu0 %v2335_v38  ;;  %2003 = vmatprep.mubr.bf16.mxu1 %v2096_v57 }
  0x5f   : > { %1978 = vmatpush3.bf16.msra.mxu0 %v2335_v38 }
  0x62   : > { %1980 = vmatmul.mubr.bf16.vlgmr.msra.gmra.mrb[16].mxu0 %v2097_v58  ;;  %2004 = vmatmul.mubr.bf16.gmra.mrb[16].mxu1 %v2098_v59 }
  0x63   : > { %1983 = vmatprep.mubr.bf16.mxu0 %v2099_v60  ;;  %2007 = vmatprep.mubr.bf16.mxu1 %v2100_v61 }
  0x6a   : > { %1984 = vmatmul.mubr.bf16.gmra.mrb[20].mxu0 %v2101_v62  ;;  %2008 = vmatmul.mubr.bf16.gmra.mrb[20].mxu1 %v2102_v63 }
 0x115   : > { %v1915_v0 = vpop.f32.mrb[0].mxu0  ;;  %v1989_v1 = vpop.f32.mrb[0].mxu1 }
 0x116   : > { %v1916_v4 = vpop.f32.mrb[1].mxu0  ;;  %v1027_v5 = vpop.f32.mrb[1].mxu1  ;;  %v1139_v29 = vadd.f32 %v1989_v1, %v2390_v2 }
 0x117   : > { %v1917_v6 = vadd.f32 %v1916_v4, %v1915_v0  ;;  %v1918_v7 = vpop.f32.mrb[2].mxu0  ;;  %v1990_v8 = vpop.f32.mrb[2].mxu1  ;;  %v1137_v12 = vadd.f32 %v2390_v2, %v1027_v5 }
 0x118   : > { %v1919_v9 = vpop.f32.mrb[3].mxu0  ;;  %v1030_v10 = vpop.f32.mrb[3].mxu1  ;;  %v1140_v32 = vadd.f32 %v1990_v8, %v2390_v2 }
 0x119   : > { %v2398_v11 = vadd.f32 %v1917_v6, %v2395_v3  ;;  %v1920_v13 = vadd.f32 %v1919_v9, %v1918_v7  ;;  %v1138_v16 = vadd.f32 %v2390_v2, %v1030_v10 }
 0x11b   : > { %v1169_v14 = vadd.f32 %v1137_v12, %v2398_v11  ;;  %v2404_v15 = vadd.f32 %v1920_v13, %v2395_v3 }
 0x11d   : > { %v1784_v17 = vpack.c.bf16 %v2404_v15, %v2398_v11  ;;  %v1170_v18 = vadd.f32 %v1138_v16, %v2404_v15  ;;  %v1921_v19 = vpop.f32.mrb[4].mxu0  ;;  %v1993_v20 = vpop.f32.mrb[4].mxu1 }
 0x11e   : > { %v1922_v21 = vpop.f32.mrb[5].mxu0  ;;  %v1043_v22 = vpop.f32.mrb[5].mxu1  ;;  %v1143_v13 = vadd.f32 %v1993_v20, %v2390_v2 }
 0x11f   : > { %1785 = vst [vmem:[%s2410_s13] sm:$0xff] %v1784_v17   ;;  %v1824_v23 = vpack.c.bf16 %v1170_v18, %v1169_v14  ;;  %v1923_v24 = vadd.f32 %v1922_v21, %v1921_v19  ;;  %v1924_v25 = vpop.f32.mrb[6].mxu0  ;;  %v2416_v26 = vpop.f32.mrb[6].mxu1  ;;  %v1141_v47 = vadd.f32 %v2390_v2, %v1043_v22 }
 0x120   : > { %v1925_v27 = vpop.f32.mrb[7].mxu0  ;;  %v1046_v28 = vpop.f32.mrb[7].mxu1 }
 0x121   : > { %1887 = vst [vmem:[%s2420_s18 + $0x20] sm:$0xff] %v1824_v23   ;;  %v2424_v30 = vadd.f32 %v1923_v24, %v2395_v3  ;;  %v1926_v31 = vadd.f32 %v1925_v27, %v1924_v25  ;;  %v1142_v57 = vadd.f32 %v2390_v2, %v1046_v28  ;;  %v1144_v23 = vadd.f32 %v2416_v26, %v2390_v2 }
 0x123   : > { %v1171_v33 = vadd.f32 %v1139_v29, %v2424_v30  ;;  %v2429_v34 = vadd.f32 %v1926_v31, %v2395_v3 }
 0x125   : > { %v1789_v35 = vpack.c.bf16 %v2429_v34, %v2424_v30  ;;  %v1172_v36 = vadd.f32 %v1140_v32, %v2429_v34  ;;  %v1927_v37 = vpop.f32.mrb[8].mxu0  ;;  %v1997_v38 = vpop.f32.mrb[8].mxu1 }
 0x126   : > { %v1147_v39 = vadd.f32 %v1997_v38, %v2390_v2  ;;  %v1928_v40 = vpop.f32.mrb[9].mxu0  ;;  %v1059_v41 = vpop.f32.mrb[9].mxu1 }
 0x127   : > { %1881 = vst [vmem:[%s2410_s13 + $0x8] sm:$0xff] %v1789_v35   ;;  %v1829_v42 = vpack.c.bf16 %v1172_v36, %v1171_v33  ;;  %v1929_v43 = vadd.f32 %v1928_v40, %v1927_v37  ;;  %v1145_v44 = vadd.f32 %v2390_v2, %v1059_v41  ;;  %v1930_v45 = vpop.f32.mrb[10].mxu0  ;;  %v1998_v46 = vpop.f32.mrb[10].mxu1 }
 0x128   : > { %v1179_v48 = vadd.f32 %v1147_v39, %v2424_v30  ;;  %v1148_v49 = vadd.f32 %v1998_v46, %v2390_v2  ;;  %v1931_v50 = vpop.f32.mrb[11].mxu0  ;;  %v1062_v51 = vpop.f32.mrb[11].mxu1 }
 0x129   : > { %1888 = vst [vmem:[%s2420_s18 + $0x28] sm:$0xff] %v1829_v42   ;;  %v2442_v52 = vadd.f32 %v1929_v43, %v2395_v3  ;;  %v1177_v53 = vadd.f32 %v1145_v44, %v2398_v11  ;;  %v1932_v54 = vadd.f32 %v1931_v50, %v1930_v45  ;;  %v1146_v55 = vadd.f32 %v2390_v2, %v1062_v51 }
 0x12a   : > { %v1180_v56 = vadd.f32 %v1148_v49, %v2429_v34 }
 0x12b   : > { %v1173_v58 = vadd.f32 %v1141_v47, %v2442_v52  ;;  %v2450_v59 = vadd.f32 %v1932_v54, %v2395_v3  ;;  %v1178_v60 = vadd.f32 %v1146_v55, %v2404_v15 }
 0x12c   : > { %v1849_v61 = vpack.c.bf16 %v1180_v56, %v1179_v48 }
 0x12d   : > { %v1794_v62 = vpack.c.bf16 %v2450_v59, %v2442_v52  ;;  %v1174_v63 = vadd.f32 %v1142_v57, %v2450_v59  ;;  %v1844_v0 = vpack.c.bf16 %v1178_v60, %v1177_v53  ;;  %v1933_v1 = vpop.f32.mrb[12].mxu0  ;;  %v2001_v4 = vpop.f32.mrb[12].mxu1 }
 0x12e   : > { %1892 = vst [vmem:[%s2420_s18 + $0x48] sm:$0xff] %v1849_v61   ;;  %v1934_v5 = vpop.f32.mrb[13].mxu0  ;;  %v1075_v6 = vpop.f32.mrb[13].mxu1  ;;  %v1151_v14 = vadd.f32 %v2001_v4, %v2390_v2 }
 0x12f   : > { %1882 = vst [vmem:[%s2410_s13 + $0x10] sm:$0xff] %v1794_v62   ;;  %v1834_v7 = vpack.c.bf16 %v1174_v63, %v1173_v58  ;;  %1891 = vst [vmem:[%s2420_s18 + $0x40] sm:$0xff] %v1844_v0   ;;  %v1935_v8 = vadd.f32 %v1934_v5, %v1933_v1  ;;  %v1149_v9 = vadd.f32 %v2390_v2, %v1075_v6  ;;  %v1936_v10 = vpop.f32.mrb[14].mxu0  ;;  %v2002_v12 = vpop.f32.mrb[14].mxu1 }
 0x130   : > { %v1937_v16 = vpop.f32.mrb[15].mxu0  ;;  %v1078_v17 = vpop.f32.mrb[15].mxu1  ;;  %v1152_v24 = vadd.f32 %v2002_v12, %v2390_v2 }
 0x131   : > { %1889 = vst [vmem:[%s2420_s18 + $0x30] sm:$0xff] %v1834_v7   ;;  %v2464_v18 = vadd.f32 %v1935_v8, %v2395_v3  ;;  %v1181_v19 = vadd.f32 %v1149_v9, %v2442_v52  ;;  %v1938_v21 = vadd.f32 %v1937_v16, %v1936_v10  ;;  %v1150_v22 = vadd.f32 %v2390_v2, %v1078_v17 }
 0x133   : > { %v1175_v20 = vadd.f32 %v1143_v13, %v2464_v18  ;;  %v1183_v25 = vadd.f32 %v1151_v14, %v2464_v18  ;;  %v2474_v27 = vadd.f32 %v1938_v21, %v2395_v3  ;;  %v1182_v28 = vadd.f32 %v1150_v22, %v2450_v59 }
 0x135   : > { %v1799_v29 = vpack.c.bf16 %v2474_v27, %v2464_v18  ;;  %v1176_v31 = vadd.f32 %v1144_v23, %v2474_v27  ;;  %v1184_v26 = vadd.f32 %v1152_v24, %v2474_v27  ;;  %v1854_v32 = vpack.c.bf16 %v1182_v28, %v1181_v19  ;;  %v1981_v33 = vpop.f32.mrb[16].mxu0  ;;  %v2005_v35 = vpop.f32.mrb[16].mxu1 }
 0x136   : > { %v1131_v36 = vadd.f32 %v1981_v33, %v2390_v2  ;;  %v1155_v37 = vadd.f32 %v2005_v35, %v2390_v2  ;;  %v995_v38 = vpop.f32.mrb[17].mxu0  ;;  %v1091_v3 = vpop.f32.mrb[17].mxu1 }
 0x137   : > { %1883 = vst [vmem:[%s2410_s13 + $0x18] sm:$0xff] %v1799_v29   ;;  %v1839_v39 = vpack.c.bf16 %v1176_v31, %v1175_v20  ;;  %v1859_v40 = vpack.c.bf16 %v1184_v26, %v1183_v25  ;;  %1893 = vst [vmem:[%s2420_s18 + $0x50] sm:$0xff] %v1854_v32   ;;  %v1129_v41 = vadd.f32 %v2390_v2, %v995_v38  ;;  %v1982_v43 = vpop.f32.mrb[18].mxu0  ;;  %v2006_v44 = vpop.f32.mrb[18].mxu1  ;;  %v1399_v26 = vld [vmem:[%s2420_s18 + $0x20] sm:$0xff] (%p2198_p5)   ;;  %v1403_v32 = vld [vmem:[%s2420_s18 + $0x28] sm:$0xff] (%p2198_p5)  }
 0x138   : > { %v1153_v42 = vadd.f32 %v2390_v2, %v1091_v3  ;;  %v1163_v45 = vadd.f32 %v1131_v36, %v2424_v30  ;;  %v1187_v46 = vadd.f32 %v1155_v37, %v2424_v30  ;;  %v1132_v47 = vadd.f32 %v1982_v43, %v2390_v2  ;;  %v998_v49 = vpop.f32.mrb[19].mxu0  ;;  %v1094_v50 = vpop.f32.mrb[19].mxu1  ;;  %1400 = vst [vmem:[%s1367_s16 + $0x40] sm:$0xff] (%p2198_p5), %v1399_v26   ;;  %v1407_v33 = vld [vmem:[%s2420_s18 + $0x30] sm:$0xff] (%p2198_p5)   ;;  %v1415_v36 = vld [vmem:[%s2420_s18 + $0x40] sm:$0xff] (%p2198_p5)   ;;  %v1419_v37 = vld [vmem:[%s2420_s18 + $0x48] sm:$0xff] (%p2198_p5)  }
 0x139   : > { %v1156_v48 = vadd.f32 %v2006_v44, %v2390_v2  ;;  %1890 = vst [vmem:[%s2420_s18 + $0x38] sm:$0xff] %v1839_v39   ;;  %1894 = vst [vmem:[%s2420_s18 + $0x58] sm:$0xff] %v1859_v40   ;;  %v1161_v51 = vadd.f32 %v1129_v41, %v2398_v11  ;;  %v1130_v54 = vadd.f32 %v2390_v2, %v998_v49 }
 0x13a   : > { %v1185_v53 = vadd.f32 %v1153_v42, %v2398_v11  ;;  %v1154_v55 = vadd.f32 %v2390_v2, %v1094_v50  ;;  %v1164_v30 = vadd.f32 %v1132_v47, %v2429_v34  ;;  %1404 = vst [vmem:[%s1367_s16 + $0x48] sm:$0xff] (%p2198_p5), %v1403_v32   ;;  %1408 = vst [vmem:[%s1367_s16 + $0x50] sm:$0xff] (%p2198_p5), %v1407_v33  }
 0x13b   : > { %v1188_v56 = vadd.f32 %v1156_v48, %v2429_v34  ;;  %v1162_v57 = vadd.f32 %v1130_v54, %v2404_v15  ;;  %1416 = vst [vmem:[%s1367_s16 + $0x80] sm:$0xff] (%p2198_p5), %v1415_v36   ;;  %1420 = vst [vmem:[%s1367_s16 + $0x88] sm:$0xff] (%p2198_p5), %v1419_v37  }
 0x13c   : > { %v1186_v58 = vadd.f32 %v1154_v55, %v2404_v15  ;;  %v1809_v60 = vpack.c.bf16 %v1164_v30, %v1163_v45 }
 0x13d   : > { %v1869_v61 = vpack.c.bf16 %v1188_v56, %v1187_v46  ;;  %v1804_v62 = vpack.c.bf16 %v1162_v57, %v1161_v51  ;;  %v1985_v0 = vpop.f32.mrb[20].mxu0  ;;  %v2009_v11 = vpop.f32.mrb[20].mxu1 }
 0x13e   : > { %v1864_v63 = vpack.c.bf16 %v1186_v58, %v1185_v53  ;;  %1884 = vst [vmem:[%s2420_s18 + $0x8] sm:$0xff] %v1809_v60   ;;  %v1135_v1 = vadd.f32 %v1985_v0, %v2390_v2  ;;  %v1159_v4 = vadd.f32 %v2009_v11, %v2390_v2  ;;  %v1011_v5 = vpop.f32.mrb[21].mxu0  ;;  %v1107_v6 = vpop.f32.mrb[21].mxu1  ;;  %v1423_v38 = vld [vmem:[%s2420_s18 + $0x50] sm:$0xff] (%p2198_p5)  }
 0x13f   : > { %1896 = vst [vmem:[%s2420_s18 + $0x68] sm:$0xff] %v1869_v61   ;;  %1805 = vst [vmem:[%s2420_s18] sm:$0xff] %v1804_v62   ;;  %v1133_v34 = vadd.f32 %v2390_v2, %v1011_v5  ;;  %v1157_v15 = vadd.f32 %v2390_v2, %v1107_v6  ;;  %v1986_v7 = vpop.f32.mrb[22].mxu0  ;;  %v2010_v8 = vpop.f32.mrb[22].mxu1 }
 0x140   : > { %1895 = vst [vmem:[%s2420_s18 + $0x60] sm:$0xff] %v1864_v63   ;;  %v1167_v9 = vadd.f32 %v1135_v1, %v2464_v18  ;;  %v1191_v10 = vadd.f32 %v1159_v4, %v2464_v18  ;;  %v1136_v12 = vadd.f32 %v1986_v7, %v2390_v2  ;;  %v1160_v13 = vadd.f32 %v2010_v8, %v2390_v2  ;;  %v1014_v14 = vpop.f32.mrb[23].mxu0  ;;  %v1110_v16 = vpop.f32.mrb[23].mxu1  ;;  %v1411_v35 = vld [vmem:[%s2420_s18 + $0x38] sm:$0xff] (%p2198_p5)  }
 0x141   : > { %v1165_v17 = vadd.f32 %v1133_v34, %v2442_v52  ;;  %v1189_v19 = vadd.f32 %v1157_v15, %v2442_v52  ;;  %v1134_v21 = vadd.f32 %v2390_v2, %v1014_v14  ;;  %v1158_v22 = vadd.f32 %v2390_v2, %v1110_v16  ;;  %1364 = sbr.rel (!%p2198_p5) target bundleno = 337 (0x151), region = 89  ;;  %1412 = vst [vmem:[%s1367_s16 + $0x58] sm:$0xff] (%p2198_p5), %v1411_v35   ;;  %v1427_v3 = vld [vmem:[%s2420_s18 + $0x58] sm:$0xff] (%p2198_p5)  }
 0x142   : > { %v1168_v18 = vadd.f32 %v1136_v12, %v2474_v27  ;;  %v1192_v23 = vadd.f32 %v1160_v13, %v2474_v27  ;;  %1424 = vst [vmem:[%s1367_s16 + $0x90] sm:$0xff] (%p2198_p5), %v1423_v38   ;;  %1428 = vst [vmem:[%s1367_s16 + $0x98] sm:$0xff] (%p2198_p5), %v1427_v3  }
 0x143   : > { %v1166_v24 = vadd.f32 %v1134_v21, %v2450_v59  ;;  %v1190_v20 = vadd.f32 %v1158_v22, %v2450_v59 }
 0x144   : > { %v1819_v25 = vpack.c.bf16 %v1168_v18, %v1167_v9  ;;  %v1879_v28 = vpack.c.bf16 %v1192_v23, %v1191_v10 }
 0x145   : > { %v1814_v29 = vpack.c.bf16 %v1166_v24, %v1165_v17  ;;  %v1874_v31 = vpack.c.bf16 %v1190_v20, %v1189_v19  ;;  %v1387_v52 = vld [vmem:[%s2420_s18 + $0x8] sm:$0xff] (%p2198_p5)  }
 0x146   : > { %1886 = vst [vmem:[%s2420_s18 + $0x18] sm:$0xff] %v1819_v25   ;;  %1898 = vst [vmem:[%s2420_s18 + $0x78] sm:$0xff] %v1879_v28   ;;  %v1383_v2 = vld [vmem:[%s2420_s18] sm:$0xff] (%p2198_p5)   ;;  %v1435_v40 = vld [vmem:[%s2420_s18 + $0x68] sm:$0xff] (%p2198_p5)  }
 0x147   : > { %1885 = vst [vmem:[%s2420_s18 + $0x10] sm:$0xff] %v1814_v29   ;;  %1897 = vst [vmem:[%s2420_s18 + $0x70] sm:$0xff] %v1874_v31   ;;  %v1431_v39 = vld [vmem:[%s2420_s18 + $0x60] sm:$0xff] (%p2198_p5)  }
 0x148   : > { %1384 = vst [vmem:[%s1367_s16] sm:$0xff] %v1383_v2   ;;  %1388 = vst [vmem:[%s1367_s16 + $0x8] sm:$0xff] %v1387_v52  }
 0x149   : > { %1432 = vst [vmem:[%s1367_s16 + $0xc0] sm:$0xff] %v1431_v39   ;;  %1436 = vst [vmem:[%s1367_s16 + $0xc8] sm:$0xff] %v1435_v40  }
 0x14d   : > { %v1395_v27 = vld [vmem:[%s2420_s18 + $0x18] sm:$0xff]  }
 0x14e   : > { %v1391_v59 = vld [vmem:[%s2420_s18 + $0x10] sm:$0xff]   ;;  %1396 = vst [vmem:[%s1367_s16 + $0x18] sm:$0xff] %v1395_v27   ;;  %v1443_v42 = vld [vmem:[%s2420_s18 + $0x78] sm:$0xff]  }
 0x14f   : > { %1392 = vst [vmem:[%s1367_s16 + $0x10] sm:$0xff] %v1391_v59   ;;  %v1439_v41 = vld [vmem:[%s2420_s18 + $0x70] sm:$0xff]   ;;  %1444 = vst [vmem:[%s1367_s16 + $0xd8] sm:$0xff] %v1443_v42  }
 0x150   : > { %1440 = vst [vmem:[%s1367_s16 + $0xd0] sm:$0xff] %v1439_v41  }
 0x151 PF: > { %p15_p11 = scmp.ge.s32.totalorder %s2186_s28, 4   ;;  %s2566_s24 = smov %s2121_s25 }
 0x152   : > { %s2567_s25 = smov %s2196_s8  ;;  %s2568_s26 = smov %s2186_s28 }
 0x153   :  { %17 = sbr.rel (!%p15_p11) target bundleno = 2 (0x2), region = 176 }

</bundles_post_ra>
